<compile_context>
chip_gen: v5e
topology: v5e:2x2
jax: 0.10.0
libtpu: 0.0.40
codegen_flags: <defaults>
</compile_context>

<pallas_src>
import functools

import numpy as np
import jax
import jax.numpy as jnp
from jax.experimental import pallas as pl
from jax.experimental.pallas import tpu as pltpu

_EPS = 1e-5              # PyTorch BatchNorm default eps
_MAX_ROW_BLOCK = 2048    # row tile for large batches (amortizes per-step overhead)
_LANES = 128
_HALF = 64               # lane offset separating even / odd pool candidates

# ---------------------------------------------------------------------------
# Config (stand-in for models/Model_2D.json, fixed deterministically in-script)
# ---------------------------------------------------------------------------
CONFIG = {
    "HLA_Shared": {
        "conv1_num_filter": 8,
        "conv2_num_filter": 8,
        "conv1_kernel_size": 3,
        "conv2_kernel_size": 3,
        "max_pool_size": 2,
        "fc_len": 32,
        "p_dropout": 0.5,
        "w_size": 1,
    },
    "HLA_A": {"fc1_len": 16, "fc2_len": 8},
    "HLA_B": {"fc1_len": 16, "fc2_len": 8},
}
INPUT_SIZE = (2, 16)                     # (H, W); conv1 kernel height 2 consumes H
OUTPUTS_SIZE = [("HLA_A", 4), ("HLA_B", 5)]

# ---------------------------------------------------------------------------
# Static shape derivation + packed-weight-slab row layout
# ---------------------------------------------------------------------------
_cfg = CONFIG["HLA_Shared"]
_H, _W = INPUT_SIZE
_HW = _H * _W                                             # 32
_C1, _C2 = _cfg["conv1_num_filter"], _cfg["conv2_num_filter"]
_K1, _K2 = _cfg["conv1_kernel_size"], _cfg["conv2_kernel_size"]
_MP, _WS = _cfg["max_pool_size"], _cfg["w_size"]
_L1 = (_W - _K1) // _WS + 1                               # 14 (conv1 out length)
_LP1 = (_L1 - 2) // _MP + 1                               # 7  (pool1 out length)
_L2 = (_LP1 - _K2) // _WS + 1                             # 5  (conv2 out length)
_LP2 = (_L2 - 2) // _MP + 1                               # 2  (pool2 out length)
_N1 = _LP1 * _C1                                          # 56
_N2 = _LP2 * _C2                                          # 16
_FC_LEN = _cfg["fc_len"]                                  # 32
_F1_SIZES = [CONFIG[name]["fc1_len"] for name, _ in OUTPUTS_SIZE]
_F1_TOTAL = sum(_F1_SIZES)                                # 32
_OUT_SIZES = [o for _, o in OUTPUTS_SIZE]
_OUT_TOTAL = sum(_OUT_SIZES)                              # 9
_OUT_W = 16                                               # padded output lane width

assert _N1 <= _HALF and _N2 <= _HALF
assert _FC_LEN <= _LANES and _F1_TOTAL <= _LANES and _OUT_TOTAL <= _OUT_W


def _ru8(x):
    return (x + 7) // 8 * 8


# Row offsets inside the single packed weight slab (all 8-row aligned).
_R_W1 = 0                          # merged conv1 Toeplitz   (HW   x 128)
_R_B1 = _R_W1 + _ru8(_HW)          # conv1+bn1 shift         (1    x 128)
_R_W2 = _R_B1 + 8                  # merged conv2 Toeplitz   (128  x 128)
_R_B2 = _R_W2 + _LANES             # conv2+bn2 shift         (1    x 128)
_R_WFC = _R_B2 + 8                 # fc (+fc_bn scale)       (128  x 128)
_R_BFC = _R_WFC + _LANES           # fc+fc_bn shift          (1    x 128)
_R_WH = _R_BFC + 8                 # heads' fc1 batched      (128  x 128)
_R_BH = _R_WH + _LANES             # heads' fc1+bn1 shift    (1    x 128)
_R_W3 = _R_BH + 8                  # fused fc3 (lane-placed) (128  x 128)
_R_B3 = _R_W3 + _LANES             # fused fc3 bias          (1    x 128)
_SLAB_ROWS = _R_B3 + 8             # 584 rows * 128 lanes * 4B ~= 300 KB


def _tc_per_chip():
    """Best-effort TensorCore-per-chip count (v7x has 2; older gens 1)."""
    try:
        kind = jax.devices()[0].device_kind.lower()
    except Exception:
        return 1
    return 2 if ("v7" in kind or "tpu7" in kind) else 1


_TC_PER_CHIP = _tc_per_chip()


# ---------------------------------------------------------------------------
# Parameter init (deterministic, PyTorch-style uniform(-1/sqrt(fan_in), ...))
# ---------------------------------------------------------------------------
def _uniform(key, shape, fan_in):
    bound = 1.0 / jnp.sqrt(jnp.float32(fan_in))
    return jax.random.uniform(key, shape, jnp.float32, -bound, bound)


def _bn_init(n):
    return dict(g=jnp.ones((n,), jnp.float32), b=jnp.zeros((n,), jnp.float32),
                m=jnp.zeros((n,), jnp.float32), v=jnp.ones((n,), jnp.float32))


def init_params(key):
    linear_input = _LP2
    keys = jax.random.split(key, 8 + 4 * len(OUTPUTS_SIZE))
    ki = iter(keys)
    p = {
        "conv1_w": _uniform(next(ki), (_C1, 1, 2, _K1), 1 * 2 * _K1),
        "conv1_b": _uniform(next(ki), (_C1,), 1 * 2 * _K1),
        "conv2_w": _uniform(next(ki), (_C2, _C1, _K2), _C1 * _K2),
        "conv2_b": _uniform(next(ki), (_C2,), _C1 * _K2),
        "fc_w": _uniform(next(ki), (_FC_LEN, _C2 * linear_input), _C2 * linear_input),
        "fc_b": _uniform(next(ki), (_FC_LEN,), _C2 * linear_input),
    }
    p.update({f"bn1_{k}": v for k, v in _bn_init(_C1).items()})
    p.update({f"bn2_{k}": v for k, v in _bn_init(_C2).items()})
    p.update({f"fc_bn_{k}": v for k, v in _bn_init(_FC_LEN).items()})

    hla = []
    for name, out_size in OUTPUTS_SIZE:
        f1 = CONFIG[name]["fc1_len"]
        hp = {
            "fc1_w": _uniform(next(ki), (f1, _FC_LEN), _FC_LEN),
            "fc1_b": _uniform(next(ki), (f1,), _FC_LEN),
            "fc3_w": _uniform(next(ki), (out_size, f1), f1),
            "fc3_b": _uniform(next(ki), (out_size,), f1),
        }
        hp.update({f"bn1_{k}": v for k, v in _bn_init(f1).items()})
        hla.append(hp)
    p["hla"] = hla
    return p


# ---------------------------------------------------------------------------
# Host-side folding: everything into ONE packed (8,128)-aligned f32 slab
# ---------------------------------------------------------------------------
def _fold_bn_np(bias, gamma, beta, mean, var):
    s = gamma / np.sqrt(var + _EPS)
    return s, (bias - mean) * s + beta


def fold_params(params):
    """Fold conv/fc weights + eval-mode BatchNorm into a single packed weight slab.

    Layout conventions inside the slab:
      * merged conv Toeplitz matrices put the "even" pool candidate in lanes
        [0, _HALF) and the "odd" candidate in lanes [_HALF, 2*_HALF); the kernel
        computes the pool max as max(y, roll(y, _HALF)).
      * zero rows in downstream weights cancel junk lanes of upstream activations,
        so activations stay lane-dense 128-wide all the way down.
    """
    p = jax.tree_util.tree_map(np.asarray, params)
    slab = np.zeros((_SLAB_ROWS, _LANES), np.float32)

    # --- conv1 + bn1: merged even|odd Toeplitz over flattened (H*W) input -----
    s1, sh1 = _fold_bn_np(p["conv1_b"], p["bn1_g"], p["bn1_b"], p["bn1_m"], p["bn1_v"])
    w1 = p["conv1_w"][:, 0] * s1[:, None, None]            # (C1, H, K1), bn scale folded
    for half in (0, 1):                                    # pool window element 0 / 1
        base = half * _HALF
        for j in range(_LP1):
            l = j * _MP + half
            for hh in range(_H):
                for k in range(_K1):
                    slab[_R_W1 + hh * _W + l * _WS + k,
                         base + j * _C1: base + (j + 1) * _C1] += w1[:, hh, k]
    slab[_R_B1, :_N1] = np.tile(sh1, _LP1)

    # --- conv2 + bn2: merged even|odd Toeplitz over the (Lp1*C1) pooled lanes --
    s2, sh2 = _fold_bn_np(p["conv2_b"], p["bn2_g"], p["bn2_b"], p["bn2_m"], p["bn2_v"])
    w2 = p["conv2_w"] * s2[:, None, None]                  # (C2, C1, K2)
    for half in (0, 1):
        base = half * _HALF
        for j in range(_LP2):
            pos = j * _MP + half
            for k in range(_K2):
                for c in range(_C1):
                    slab[_R_W2 + (pos * _WS + k) * _C1 + c,
                         base + j * _C2: base + (j + 1) * _C2] += w2[:, c, k]
    slab[_R_B2, :_N2] = np.tile(sh2, _LP2)

    # --- fc + fc_bn: kernel lane j*C2+d <-> torch flattened feature d*Lp2+j ----
    sfc, shfc = _fold_bn_np(p["fc_b"], p["fc_bn_g"], p["fc_bn_b"],
                            p["fc_bn_m"], p["fc_bn_v"])
    for j in range(_LP2):
        for d in range(_C2):
            slab[_R_WFC + j * _C2 + d, :_FC_LEN] = p["fc_w"][:, d * _LP2 + j] * sfc
    slab[_R_BFC, :_FC_LEN] = shfc

    # --- HLA heads: fc1(+bn1) batched along lanes; fc3 fused with lane offsets -
    col_f1 = 0
    col_out = 0
    for hp, (name, osz) in zip(p["hla"], OUTPUTS_SIZE):
        f1 = CONFIG[name]["fc1_len"]
        s, sh = _fold_bn_np(hp["fc1_b"], hp["bn1_g"], hp["bn1_b"],
                            hp["bn1_m"], hp["bn1_v"])
        slab[_R_WH:_R_WH + _FC_LEN, col_f1:col_f1 + f1] = hp["fc1_w"].T * s[None, :]
        slab[_R_BH, col_f1:col_f1 + f1] = sh
        slab[_R_W3 + col_f1:_R_W3 + col_f1 + f1, col_out:col_out + osz] = hp["fc3_w"].T
        slab[_R_B3, col_out:col_out + osz] = hp["fc3_b"]
        col_f1 += f1
        col_out += osz

    return {"slab": jnp.asarray(slab)}


# ---------------------------------------------------------------------------
# The single fused Pallas kernel (2 input DMA windows: x block + weight slab)
# ---------------------------------------------------------------------------
def _fused_kernel(x_ref, w_ref, o_ref):
    f32 = jnp.float32

    def wblk(row, nrows):
        return w_ref[pl.ds(row, nrows), :]          # static slice of resident slab

    x = x_ref[...]                                  # (rows, H*W)

    # conv1 (+bias, bn1 folded) + MaxPool1d(2,2) + relu:
    # one merged Toeplitz matmul emits both pool candidates (even | odd lane
    # halves); pool max = roll by 64 lanes + elementwise max. Per-channel shift
    # and relu commute with the max, so bn->relu->pool order is preserved.
    y1 = jnp.dot(x, wblk(_R_W1, _HW), preferred_element_type=f32)      # (rows, 128)
    m1 = jnp.maximum(y1, pltpu.roll(y1, shift=_HALF, axis=1))
    p1 = jnp.maximum(m1 + wblk(_R_B1, 1), 0.0)      # lanes >= _N1: junk, zeroed by w2 rows

    # conv2 (+bias, bn2 folded) + MaxPool1d(2,2) + relu — same trick.
    y2 = jnp.dot(p1, wblk(_R_W2, _LANES), preferred_element_type=f32)
    m2 = jnp.maximum(y2, pltpu.roll(y2, shift=_HALF, axis=1))
    p2 = jnp.maximum(m2 + wblk(_R_B2, 1), 0.0)      # lanes >= _N2: junk, zeroed by wfc rows

    # fc + fc_bn + relu.
    # TODO(synk): F.dropout is the identity here (inference / eval mode only).
    h = jnp.maximum(
        jnp.dot(p2, wblk(_R_WFC, _LANES), preferred_element_type=f32)
        + wblk(_R_BFC, 1), 0.0)

    # Both heads' fc1 + bn1 + relu batched along the lane axis.
    g = jnp.maximum(
        jnp.dot(h, wblk(_R_WH, _LANES), preferred_element_type=f32)
        + wblk(_R_BH, 1), 0.0)

    # Fused fc3 for all heads (per-head lane offsets baked into the weight),
    # then narrow to the padded output width.
    logits = (jnp.dot(g, wblk(_R_W3, _LANES), preferred_element_type=f32)
              + wblk(_R_B3, 1))[:, :_OUT_W]                            # (rows, 16)

    # Per-head masked softmax via lane-id masks (no selector matmuls).
    lane = jax.lax.broadcasted_iota(jnp.int32, logits.shape, 1)
    probs = jnp.zeros_like(logits)
    off = 0
    for osz in _OUT_SIZES:
        mask = (lane >= off) & (lane < off + osz)
        mx = jnp.max(jnp.where(mask, logits, -jnp.inf), axis=1, keepdims=True)
        e = jnp.where(mask, jnp.exp(logits - mx), 0.0)
        denom = jnp.sum(e, axis=1, keepdims=True)
        probs = probs + e * pl.reciprocal(denom, approx=True)          # EUP slot
        off += osz

    o_ref[...] = probs


# ---------------------------------------------------------------------------
# SharedNet2D forward (inference)
# ---------------------------------------------------------------------------
def _choose_block_rows(n):
    n8 = max(_ru8(n), 8)                            # whole sublane groups
    # v7x has 2 TensorCores per chip; split into >= 2 "parallel" blocks so both
    # are used. Harmless (one extra tiny grid step) if detection is wrong.
    min_blocks = 2 if (_TC_PER_CHIP >= 2 and n8 >= 16) else 1
    block_rows = min(_MAX_ROW_BLOCK, _ru8(-(-n8 // min_blocks)))
    n_pad = -(-n8 // block_rows) * block_rows
    return block_rows, n_pad


def shared_net2d_forward(kparams, x):
    slab = kparams["slab"]
    x2 = x.reshape(-1, _HW).astype(jnp.float32)
    n = x2.shape[0]

    block_rows, n_pad = _choose_block_rows(n)
    if n_pad != n:
        x2 = jnp.pad(x2, ((0, n_pad - n), (0, 0)))

    out = pl.pallas_call(
        _fused_kernel,
        out_shape=jax.ShapeDtypeStruct((n_pad, _OUT_W), jnp.float32),
        grid=(n_pad // block_rows,),
        in_specs=[
            pl.BlockSpec((block_rows, _HW), lambda i: (i, 0)),
            pl.BlockSpec((_SLAB_ROWS, _LANES), lambda i: (0, 0)),  # resident weights
        ],
        out_specs=pl.BlockSpec((block_rows, _OUT_W), lambda i: (i, 0)),
        compiler_params=pltpu.CompilerParams(
            dimension_semantics=("parallel",),
            vmem_limit_bytes=32 * 1024 * 1024),
    )(x2, slab)
    return out[:n, :_OUT_TOTAL]


if __name__ == "__main__":
    key = jax.random.PRNGKey(0)
    pkey, xkey = jax.random.split(key)
    params = init_params(pkey)
    kparams = fold_params(params)        # one-time host-side weight folding/packing

    batch = 4
    x = jax.random.normal(xkey, (batch, INPUT_SIZE[0], INPUT_SIZE[1]), jnp.float32)

    fwd = jax.jit(functools.partial(shared_net2d_forward, kparams))
    out = jax.block_until_ready(fwd(x))

    assert out.shape == (batch, _OUT_TOTAL), out.shape
    assert bool(jnp.all(jnp.isfinite(out)))
    # each head's softmax rows sum to 1 (approx-reciprocal => ~1e-3 tolerance)
    off = 0
    for _, o in OUTPUTS_SIZE:
        sums = jnp.sum(out[:, off:off + o], axis=1)
        assert bool(jnp.allclose(sums, 1.0, atol=1e-2)), sums
        off += o
    print("KERNEL_OK")
</pallas_src>

<mosaic_0001>
module attributes {stable_mosaic.version = 11 : i64} {
  func.func @_fused_kernel(%arg0: i32, %arg1: memref<8x32xf32, #tpu.memory_space<vmem>>, %arg2: memref<584x128xf32, #tpu.memory_space<vmem>>, %arg3: memref<8x16xf32, #tpu.memory_space<vmem>>) attributes {dimension_semantics = [#tpu.dimension_semantics<parallel>], iteration_bounds = array<i64: 1>, scalar_prefetch = 0 : i64, scratch_operands = 0 : i64, tpu.core_type = #tpu.core_type<tc>, window_params = [{transform_indices = @transform_0, window_bounds = array<i64: 8, 32>}, {pipeline_mode = #tpu.pipeline_mode<synchronous>, transform_indices = @transform_1, window_bounds = array<i64: 584, 128>}, {transform_indices = @transform_2, window_bounds = array<i64: 8, 16>}]} {
    %c0 = arith.constant 0 : index
    %c0_0 = arith.constant 0 : index
    %0 = vector.load %arg1[%c0, %c0_0] : memref<8x32xf32, #tpu.memory_space<vmem>>, vector<8x32xf32>
    %c0_1 = arith.constant 0 : index
    %c0_2 = arith.constant 0 : index
    %1 = vector.load %arg2[%c0_1, %c0_2] : memref<584x128xf32, #tpu.memory_space<vmem>>, vector<32x128xf32>
    %cst = arith.constant dense<0.000000e+00> : vector<8x128xf32>
    %2 = tpu.matmul %0, %1, %cst {dimension_numbers = #tpu.dot_dimension_numbers<[1], [0], [0], [1], [0, 0, 1, 1], [], []>} : vector<8x32xf32>, vector<32x128xf32>, vector<8x128xf32> -> vector<8x128xf32>
    %c64_i32 = arith.constant 64 : i32
    %3 = tpu.dynamic_rotate %2 by %c64_i32 dim 1 : vector<8x128xf32>, i32 -> vector<8x128xf32>
    %4 = arith.maximumf %2, %3 : vector<8x128xf32>
    %c32 = arith.constant 32 : index
    %c0_3 = arith.constant 0 : index
    %5 = vector.load %arg2[%c32, %c0_3] : memref<584x128xf32, #tpu.memory_space<vmem>>, vector<1x128xf32>
    %6 = vector.broadcast %5 : vector<1x128xf32> to vector<8x128xf32>
    %7 = arith.addf %4, %6 : vector<8x128xf32>
    %cst_4 = arith.constant 0.000000e+00 : f32
    %8 = vector.broadcast %cst_4 : f32 to vector<8x128xf32>
    %9 = arith.maximumf %7, %8 : vector<8x128xf32>
    %c40 = arith.constant 40 : index
    %c0_5 = arith.constant 0 : index
    %10 = vector.load %arg2[%c40, %c0_5] : memref<584x128xf32, #tpu.memory_space<vmem>>, vector<128x128xf32>
    %cst_6 = arith.constant dense<0.000000e+00> : vector<8x128xf32>
    %11 = tpu.matmul %9, %10, %cst_6 {dimension_numbers = #tpu.dot_dimension_numbers<[1], [0], [0], [1], [0, 0, 1, 1], [], []>} : vector<8x128xf32>, vector<128x128xf32>, vector<8x128xf32> -> vector<8x128xf32>
    %c64_i32_7 = arith.constant 64 : i32
    %12 = tpu.dynamic_rotate %11 by %c64_i32_7 dim 1 : vector<8x128xf32>, i32 -> vector<8x128xf32>
    %13 = arith.maximumf %11, %12 : vector<8x128xf32>
    %c168 = arith.constant 168 : index
    %c0_8 = arith.constant 0 : index
    %14 = vector.load %arg2[%c168, %c0_8] : memref<584x128xf32, #tpu.memory_space<vmem>>, vector<1x128xf32>
    %15 = vector.broadcast %14 : vector<1x128xf32> to vector<8x128xf32>
    %16 = arith.addf %13, %15 : vector<8x128xf32>
    %cst_9 = arith.constant 0.000000e+00 : f32
    %17 = vector.broadcast %cst_9 : f32 to vector<8x128xf32>
    %18 = arith.maximumf %16, %17 : vector<8x128xf32>
    %c176 = arith.constant 176 : index
    %c0_10 = arith.constant 0 : index
    %19 = vector.load %arg2[%c176, %c0_10] : memref<584x128xf32, #tpu.memory_space<vmem>>, vector<128x128xf32>
    %cst_11 = arith.constant dense<0.000000e+00> : vector<8x128xf32>
    %20 = tpu.matmul %18, %19, %cst_11 {dimension_numbers = #tpu.dot_dimension_numbers<[1], [0], [0], [1], [0, 0, 1, 1], [], []>} : vector<8x128xf32>, vector<128x128xf32>, vector<8x128xf32> -> vector<8x128xf32>
    %c304 = arith.constant 304 : index
    %c0_12 = arith.constant 0 : index
    %21 = vector.load %arg2[%c304, %c0_12] : memref<584x128xf32, #tpu.memory_space<vmem>>, vector<1x128xf32>
    %22 = vector.broadcast %21 : vector<1x128xf32> to vector<8x128xf32>
    %23 = arith.addf %20, %22 : vector<8x128xf32>
    %cst_13 = arith.constant 0.000000e+00 : f32
    %24 = vector.broadcast %cst_13 : f32 to vector<8x128xf32>
    %25 = arith.maximumf %23, %24 : vector<8x128xf32>
    %c312 = arith.constant 312 : index
    %c0_14 = arith.constant 0 : index
    %26 = vector.load %arg2[%c312, %c0_14] : memref<584x128xf32, #tpu.memory_space<vmem>>, vector<128x128xf32>
    %cst_15 = arith.constant dense<0.000000e+00> : vector<8x128xf32>
    %27 = tpu.matmul %25, %26, %cst_15 {dimension_numbers = #tpu.dot_dimension_numbers<[1], [0], [0], [1], [0, 0, 1, 1], [], []>} : vector<8x128xf32>, vector<128x128xf32>, vector<8x128xf32> -> vector<8x128xf32>
    %c440 = arith.constant 440 : index
    %c0_16 = arith.constant 0 : index
    %28 = vector.load %arg2[%c440, %c0_16] : memref<584x128xf32, #tpu.memory_space<vmem>>, vector<1x128xf32>
    %29 = vector.broadcast %28 : vector<1x128xf32> to vector<8x128xf32>
    %30 = arith.addf %27, %29 : vector<8x128xf32>
    %cst_17 = arith.constant 0.000000e+00 : f32
    %31 = vector.broadcast %cst_17 : f32 to vector<8x128xf32>
    %32 = arith.maximumf %30, %31 : vector<8x128xf32>
    %c448 = arith.constant 448 : index
    %c0_18 = arith.constant 0 : index
    %33 = vector.load %arg2[%c448, %c0_18] : memref<584x128xf32, #tpu.memory_space<vmem>>, vector<128x128xf32>
    %cst_19 = arith.constant dense<0.000000e+00> : vector<8x128xf32>
    %34 = tpu.matmul %32, %33, %cst_19 {dimension_numbers = #tpu.dot_dimension_numbers<[1], [0], [0], [1], [0, 0, 1, 1], [], []>} : vector<8x128xf32>, vector<128x128xf32>, vector<8x128xf32> -> vector<8x128xf32>
    %c576 = arith.constant 576 : index
    %c0_20 = arith.constant 0 : index
    %35 = vector.load %arg2[%c576, %c0_20] : memref<584x128xf32, #tpu.memory_space<vmem>>, vector<1x128xf32>
    %36 = vector.broadcast %35 : vector<1x128xf32> to vector<8x128xf32>
    %37 = arith.addf %34, %36 : vector<8x128xf32>
    %38 = vector.extract_strided_slice %37 {offsets = [0, 0], sizes = [8, 16], strides = [1, 1]} : vector<8x128xf32> to vector<8x16xf32>
    %39 = tpu.iota {dimensions = array<i32: 1>} : vector<8x16xi32>
    %cst_21 = arith.constant 0.000000e+00 : f32
    %40 = vector.broadcast %cst_21 : f32 to vector<8x16xf32>
    %c0_i32 = arith.constant 0 : i32
    %41 = vector.broadcast %c0_i32 : i32 to vector<8x16xi32>
    %42 = arith.cmpi sge, %39, %41 : vector<8x16xi32>
    %c4_i32 = arith.constant 4 : i32
    %43 = vector.broadcast %c4_i32 : i32 to vector<8x16xi32>
    %44 = arith.cmpi slt, %39, %43 : vector<8x16xi32>
    %45 = arith.andi %42, %44 : vector<8x16xi1>
    %cst_22 = arith.constant 0xFF800000 : f32
    %46 = vector.broadcast %cst_22 : f32 to vector<8x16xf32>
    %47 = arith.select %45, %38, %46 : vector<8x16xi1>, vector<8x16xf32>
    %cst_23 = arith.constant dense<0xFF800000> : vector<8xf32>
    %48 = vector.multi_reduction <maximumf>, %47, %cst_23 [1] : vector<8x16xf32> to vector<8xf32>
    %49 = vector.shape_cast %48 : vector<8xf32> to vector<8x1xf32>
    %50 = vector.broadcast %49 : vector<8x1xf32> to vector<8x16xf32>
    %51 = arith.subf %38, %50 : vector<8x16xf32>
    %52 = math.exp %51 : vector<8x16xf32>
    %cst_24 = arith.constant 0.000000e+00 : f32
    %53 = vector.broadcast %cst_24 : f32 to vector<8x16xf32>
    %54 = arith.select %45, %52, %53 : vector<8x16xi1>, vector<8x16xf32>
    %cst_25 = arith.constant dense<0.000000e+00> : vector<8xf32>
    %55 = vector.multi_reduction <add>, %54, %cst_25 [1] : vector<8x16xf32> to vector<8xf32>
    %56 = vector.shape_cast %55 : vector<8xf32> to vector<8x1xf32>
    %57 = tpu.reciprocal %56 {approx = true} : vector<8x1xf32> -> vector<8x1xf32>
    %58 = vector.broadcast %57 : vector<8x1xf32> to vector<8x16xf32>
    %59 = arith.mulf %54, %58 : vector<8x16xf32>
    %60 = arith.addf %40, %59 : vector<8x16xf32>
    %c4_i32_26 = arith.constant 4 : i32
    %61 = vector.broadcast %c4_i32_26 : i32 to vector<8x16xi32>
    %62 = arith.cmpi sge, %39, %61 : vector<8x16xi32>
    %c9_i32 = arith.constant 9 : i32
    %63 = vector.broadcast %c9_i32 : i32 to vector<8x16xi32>
    %64 = arith.cmpi slt, %39, %63 : vector<8x16xi32>
    %65 = arith.andi %62, %64 : vector<8x16xi1>
    %cst_27 = arith.constant 0xFF800000 : f32
    %66 = vector.broadcast %cst_27 : f32 to vector<8x16xf32>
    %67 = arith.select %65, %38, %66 : vector<8x16xi1>, vector<8x16xf32>
    %cst_28 = arith.constant dense<0xFF800000> : vector<8xf32>
    %68 = vector.multi_reduction <maximumf>, %67, %cst_28 [1] : vector<8x16xf32> to vector<8xf32>
    %69 = vector.shape_cast %68 : vector<8xf32> to vector<8x1xf32>
    %70 = vector.broadcast %69 : vector<8x1xf32> to vector<8x16xf32>
    %71 = arith.subf %38, %70 : vector<8x16xf32>
    %72 = math.exp %71 : vector<8x16xf32>
    %cst_29 = arith.constant 0.000000e+00 : f32
    %73 = vector.broadcast %cst_29 : f32 to vector<8x16xf32>
    %74 = arith.select %65, %72, %73 : vector<8x16xi1>, vector<8x16xf32>
    %cst_30 = arith.constant dense<0.000000e+00> : vector<8xf32>
    %75 = vector.multi_reduction <add>, %74, %cst_30 [1] : vector<8x16xf32> to vector<8xf32>
    %76 = vector.shape_cast %75 : vector<8xf32> to vector<8x1xf32>
    %77 = tpu.reciprocal %76 {approx = true} : vector<8x1xf32> -> vector<8x1xf32>
    %78 = vector.broadcast %77 : vector<8x1xf32> to vector<8x16xf32>
    %79 = arith.mulf %74, %78 : vector<8x16xf32>
    %80 = arith.addf %60, %79 : vector<8x16xf32>
    %c0_31 = arith.constant 0 : index
    %c0_32 = arith.constant 0 : index
    %81 = vector.load %arg3[%c0_31, %c0_32] : memref<8x16xf32, #tpu.memory_space<vmem>>, vector<8x16xf32>
    tpu.vector_store %arg3[%c0_31, %c0_32], %80 {strides = array<i32>} : memref<8x16xf32, #tpu.memory_space<vmem>>, vector<8x16xf32>,
    return
  }
  func.func @transform_0(%arg0: i32) -> (i32, i32) {
    %c0_i32 = arith.constant 0 : i32
    %c0_i32_0 = arith.constant 0 : i32
    return %arg0, %c0_i32 : i32, i32
  }
  func.func @transform_1(%arg0: i32) -> (i32, i32) {
    %c0_i32 = arith.constant 0 : i32
    %c0_i32_0 = arith.constant 0 : i32
    %c0_i32_1 = arith.constant 0 : i32
    return %c0_i32, %c0_i32_0 : i32, i32
  }
  func.func @transform_2(%arg0: i32) -> (i32, i32) {
    %c0_i32 = arith.constant 0 : i32
    %c0_i32_0 = arith.constant 0 : i32
    return %arg0, %c0_i32 : i32, i32
  }
}

</mosaic_0001>

<bundles_post_ra>
// kernel: shared_net2d_forward.1
= control target key start
LH: loop header
LB: loop body
LE: loop exit
PB: predicated region body
PF: predicated region fallthrough
CT: control target
= control target key end

     0   :  { %7 = vsyncpa [#allocation3], 0  ;;  %s309_s12 = smov [#allocation2]   ;;  %s310_s14 = smov 128   ;;  %s354_s0 = inlined_call_operand.vmem [shape: f32[8,32], index: 0, kind: input, shape index: {}]   ;;  %s355_s1 = inlined_call_operand.hbm [shape: f32[584,128], index: 1, kind: input, shape index: {}]   ;;  %s356_s2 = inlined_call_operand.vmem [shape: f32[8,16], index: 2, kind: output, shape index: {}]  }
   0x1   :  { %s14_s11 = sshll.u32 %s355_s1, 4  ;;  %s16_s13 = sshll.u32 %s309_s12, 4  ;;  %s15_s11 = int_to_ptr.hbm [resolvable:$true] %s14_s11  ;;  %s17_s13 = int_to_ptr.vmem [resolvable:$true] %s16_s13 }
   0x2   :  { %s311_s15 = smov 8  }
   0x3   :  { %22 = dma.hbm_to_vmem [thread:$0]  %s15_s11, 9344, %s17_s13, [#allocation3], %s310_s14, %s310_s14, %s311_s15  }
   0x4   :  { %307 = dma.done.wait [#allocation3], 9344  }
   0x5   :  { %308 = vsyncadd [#allocation3], 4294957952  ;;  %v31_v0 = vld [vmem:[#allocation2 + $0x18] sm:$0xff]  ;;  %v30_v1 = vld [vmem:[#allocation2 + $0x10] sm:$0xff]  ;;  %vm32_vm0 = vcmask 261120   ;;  %vm228_vm2 = vcmask 130048  }
   0x6   :  { %48 = vmatpush.msra.mxu0 %v31_v0  ;;  %v29_v2 = vld [vmem:[#allocation2 + $0x8] sm:$0xff]  ;;  %v28_v3 = vld [vmem:[#allocation2] sm:$0xff]  ;;  %v77_v6 = vld [vmem:[#allocation2 + $0x98] sm:$0xff] }
   0x7   :  { %v27_v4 = vld [vmem:[%s354_s0] sm:$0xff]  ;;  %v76_v7 = vld [vmem:[#allocation2 + $0x90] sm:$0xff]  ;;  %v75_v8 = vld [vmem:[#allocation2 + $0x88] sm:$0xff]  ;;  %s312_s0 = smov 64  }
   0x8   :  { %49 = vmatpush.msra.mxu0 %v30_v1  ;;  %v78_v5 = vld [vmem:[#allocation2 + $0xa0] sm:$0xff]  ;;  %v73_v10 = vld [vmem:[#allocation2 + $0x78] sm:$0xff]  ;;  %v72_v11 = vld [vmem:[#allocation2 + $0x70] sm:$0xff] }
   0x9   :  { %79 = vmatpush.msra.mxu1 %v78_v5  ;;  %v74_v9 = vld [vmem:[#allocation2 + $0x80] sm:$0xff]  ;;  %v71_v12 = vld [vmem:[#allocation2 + $0x68] sm:$0xff]  ;;  %v69_v14 = vld [vmem:[#allocation2 + $0x58] sm:$0xff] }
   0xa   :  { %50 = vmatpush.msra.mxu0 %v29_v2  ;;  %v70_v13 = vld [vmem:[#allocation2 + $0x60] sm:$0xff]  ;;  %v68_v15 = vld [vmem:[#allocation2 + $0x50] sm:$0xff]  ;;  %v67_v16 = vld [vmem:[#allocation2 + $0x48] sm:$0xff] }
   0xb   :  { %80 = vmatpush.msra.mxu1 %v77_v6  ;;  %v66_v17 = vld [vmem:[#allocation2 + $0x40] sm:$0xff]  ;;  %v65_v19 = vld [vmem:[#allocation2 + $0x38] sm:$0xff]  ;;  %v64_v20 = vld [vmem:[#allocation2 + $0x30] sm:$0xff] }
   0xc   :  { %51 = vmatpush.msra.mxu0 %v28_v3  ;;  %v63_v21 = vld [vmem:[#allocation2 + $0x28] sm:$0xff]  ;;  %v270_v22 = vld [vmem:[#allocation2 + $0x20] ss:$0 sm:$0xff]  ;;  %v119_v29 = vld [vmem:[#allocation2 + $0x118] sm:$0xff] }
   0xd   :  { %265 = vmatmul.msk.f32.vlgmr.msra.gmra.mxu0 %vm32_vm0, %v27_v4  ;;  %81 = vmatpush.msra.mxu1 %v76_v7  ;;  %v121_v27 = vld [vmem:[#allocation2 + $0x128] sm:$0xff]  ;;  %v120_v28 = vld [vmem:[#allocation2 + $0x120] sm:$0xff]  ;;  %v118_v30 = vld [vmem:[#allocation2 + $0x110] sm:$0xff] }
   0xe   :  { %124 = vmatpush.msra.mxu2 %v121_v27  ;;  %v117_v31 = vld [vmem:[#allocation2 + $0x108] sm:$0xff]  ;;  %v116_v32 = vld [vmem:[#allocation2 + $0x100] sm:$0xff]  ;;  %v115_v33 = vld [vmem:[#allocation2 + $0xf8] sm:$0xff] }
   0xf   :  { %82 = vmatpush.msra.mxu1 %v75_v8  ;;  %v114_v34 = vld [vmem:[#allocation2 + $0xf0] sm:$0xff]  ;;  %v113_v35 = vld [vmem:[#allocation2 + $0xe8] sm:$0xff]  ;;  %v112_v36 = vld [vmem:[#allocation2 + $0xe0] sm:$0xff] }
  0x10   :  { %125 = vmatpush.msra.mxu2 %v120_v28  ;;  %v111_v37 = vld [vmem:[#allocation2 + $0xd8] sm:$0xff]  ;;  %v110_v38 = vld [vmem:[#allocation2 + $0xd0] sm:$0xff]  ;;  %v109_v39 = vld [vmem:[#allocation2 + $0xc8] sm:$0xff] }
  0x11   :  { %83 = vmatpush.msra.mxu1 %v74_v9  ;;  %v108_v41 = vld [vmem:[#allocation2 + $0xc0] sm:$0xff]  ;;  %v107_v42 = vld [vmem:[#allocation2 + $0xb8] sm:$0xff]  ;;  %v106_v43 = vld [vmem:[#allocation2 + $0xb0] sm:$0xff] }
  0x12   :  { %126 = vmatpush.msra.mxu2 %v119_v29  ;;  %v160_v44 = vld [vmem:[#allocation2 + $0x1b0] sm:$0xff]  ;;  %v159_v45 = vld [vmem:[#allocation2 + $0x1a8] sm:$0xff]  ;;  %v158_v46 = vld [vmem:[#allocation2 + $0x1a0] sm:$0xff] }
  0x13   :  { %84 = vmatpush.msra.mxu1 %v73_v10  ;;  %163 = vmatpush.msra.mxu3 %v160_v44  ;;  %v157_v47 = vld [vmem:[#allocation2 + $0x198] sm:$0xff]  ;;  %v156_v48 = vld [vmem:[#allocation2 + $0x190] sm:$0xff]  ;;  %v155_v49 = vld [vmem:[#allocation2 + $0x188] sm:$0xff] }
  0x14   :  { %127 = vmatpush.msra.mxu2 %v118_v30  ;;  %v154_v50 = vld [vmem:[#allocation2 + $0x180] sm:$0xff]  ;;  %v153_v51 = vld [vmem:[#allocation2 + $0x178] sm:$0xff]  ;;  %v152_v52 = vld [vmem:[#allocation2 + $0x170] sm:$0xff] }
  0x15   :  { %85 = vmatpush.msra.mxu1 %v72_v11  ;;  %164 = vmatpush.msra.mxu3 %v159_v45  ;;  %v151_v53 = vld [vmem:[#allocation2 + $0x168] sm:$0xff]  ;;  %v150_v54 = vld [vmem:[#allocation2 + $0x160] sm:$0xff]  ;;  %v149_v55 = vld [vmem:[#allocation2 + $0x158] sm:$0xff] }
  0x16   :  { %128 = vmatpush.msra.mxu2 %v117_v31  ;;  %v148_v56 = vld [vmem:[#allocation2 + $0x150] sm:$0xff]  ;;  %v271_v57 = vld [vmem:[#allocation2 + $0xa8] ss:$0 sm:$0xff]  ;;  %v146_v63 = vld [vmem:[#allocation2 + $0x140] sm:$0xff] }
  0x17   :  { %86 = vmatpush.msra.mxu1 %v71_v12  ;;  %165 = vmatpush.msra.mxu3 %v158_v46  ;;  %v147_v62 = vld [vmem:[#allocation2 + $0x148] sm:$0xff]  ;;  %v145_v0 = vld [vmem:[#allocation2 + $0x138] sm:$0xff]  ;;  %v198_v2 = vld [vmem:[#allocation2 + $0x230] sm:$0xff] }
  0x18   :  { %129 = vmatpush.msra.mxu2 %v116_v32  ;;  %v199_v1 = vld [vmem:[#allocation2 + $0x238] sm:$0xff]  ;;  %v197_v3 = vld [vmem:[#allocation2 + $0x228] sm:$0xff]  ;;  %v196_v4 = vld [vmem:[#allocation2 + $0x220] sm:$0xff] }
  0x19   :  { %87 = vmatpush.msra.mxu1 %v70_v13  ;;  %166 = vmatpush.msra.mxu3 %v157_v47  ;;  %v195_v5 = vld [vmem:[#allocation2 + $0x218] sm:$0xff]  ;;  %v194_v6 = vld [vmem:[#allocation2 + $0x210] sm:$0xff]  ;;  %v193_v7 = vld [vmem:[#allocation2 + $0x208] sm:$0xff] }
  0x1a   :  { %130 = vmatpush.msra.mxu2 %v115_v33  ;;  %202 = vmatpush.msrb.mxu0 %v199_v1  ;;  %v192_v8 = vld [vmem:[#allocation2 + $0x200] sm:$0xff]  ;;  %v191_v9 = vld [vmem:[#allocation2 + $0x1f8] sm:$0xff]  ;;  %v190_v10 = vld [vmem:[#allocation2 + $0x1f0] sm:$0xff] }
  0x1b   :  { %88 = vmatpush.msra.mxu1 %v69_v14  ;;  %167 = vmatpush.msra.mxu3 %v156_v48  ;;  %v189_v11 = vld [vmem:[#allocation2 + $0x1e8] sm:$0xff]  ;;  %v188_v12 = vld [vmem:[#allocation2 + $0x1e0] sm:$0xff]  ;;  %v187_v13 = vld [vmem:[#allocation2 + $0x1d8] sm:$0xff] }
  0x1c   :  { %131 = vmatpush.msra.mxu2 %v114_v34  ;;  %203 = vmatpush.msrb.mxu0 %v198_v2  ;;  %v272_v14 = vld [vmem:[#allocation2 + $0x130] ss:$0 sm:$0xff]  ;;  %v274_v27 = vld [vmem:[#allocation2 + $0x240] ss:$0 sm:$0xff] }
  0x1d   :  { %89 = vmatpush.msra.mxu1 %v68_v15  ;;  %168 = vmatpush.msra.mxu3 %v155_v49 }
  0x1e   :  { %132 = vmatpush.msra.mxu2 %v113_v35  ;;  %204 = vmatpush.msrb.mxu0 %v197_v3 }
  0x1f   :  { %90 = vmatpush.msra.mxu1 %v67_v16  ;;  %169 = vmatpush.msra.mxu3 %v154_v50 }
  0x20   :  { %133 = vmatpush.msra.mxu2 %v112_v36  ;;  %205 = vmatpush.msrb.mxu0 %v196_v4 }
  0x21   :  { %91 = vmatpush.msra.mxu1 %v66_v17  ;;  %170 = vmatpush.msra.mxu3 %v153_v51 }
  0x22   :  { %134 = vmatpush.msra.mxu2 %v111_v37  ;;  %206 = vmatpush.msrb.mxu0 %v195_v5 }
  0x23   :  { %92 = vmatpush.msra.mxu1 %v65_v19  ;;  %171 = vmatpush.msra.mxu3 %v152_v52  ;;  %v185_v19 = vld [vmem:[#allocation2 + $0x1c8] sm:$0xff] }
  0x24   :  { %135 = vmatpush.msra.mxu2 %v110_v38  ;;  %207 = vmatpush.msrb.mxu0 %v194_v6 }
  0x25   :  { %93 = vmatpush.msra.mxu1 %v64_v20  ;;  %172 = vmatpush.msra.mxu3 %v151_v53  ;;  %v184_v20 = vld [vmem:[#allocation2 + $0x1c0] sm:$0xff] }
  0x26   :  { %136 = vmatpush.msra.mxu2 %v109_v39  ;;  %208 = vmatpush.msrb.mxu0 %v193_v7 }
  0x27   :  { %94 = vmatpush.msra.mxu1 %v63_v21  ;;  %173 = vmatpush.msra.mxu3 %v150_v54  ;;  %v273_v21 = vld [vmem:[#allocation2 + $0x1b8] ss:$0 sm:$0xff] }
  0x28   :  { %137 = vmatpush.msra.mxu2 %v108_v41  ;;  %209 = vmatpush.msrb.mxu0 %v192_v8 }
  0x29   :  { %174 = vmatpush.msra.mxu3 %v149_v55 }
  0x2a   :  { %138 = vmatpush.msra.mxu2 %v107_v42  ;;  %210 = vmatpush.msrb.mxu0 %v191_v9 }
  0x2b   :  { %175 = vmatpush.msra.mxu3 %v148_v56 }
  0x2c   :  { %139 = vmatpush.msra.mxu2 %v106_v43  ;;  %211 = vmatpush.msrb.mxu0 %v190_v10 }
  0x2d   :  { %176 = vmatpush.msra.mxu3 %v147_v62 }
  0x2e   :  { %212 = vmatpush.msrb.mxu0 %v189_v11 }
  0x2f   :  { %177 = vmatpush.msra.mxu3 %v146_v63 }
  0x30   :  { %213 = vmatpush.msrb.mxu0 %v188_v12 }
  0x31   :  { %178 = vmatpush.msra.mxu3 %v145_v0 }
  0x32   :  { %214 = vmatpush.msrb.mxu0 %v187_v13 }
  0x8a   :  { %v53_v18 = vpop.f32.mrf.mxu0 }
  0x8b   :  { %56 = vrot.lane.b32.xlu0 %v53_v18, %s312_s0 }
  0xfd   :  { %v57_v23 = vpop.permute.xlu0 %56 }
  0xfe   :  { %v58_v24 = vmax.f32 %v53_v18, %v57_v23  ;;  %v186_v18 = vld [vmem:[#allocation2 + $0x1d0] sm:$0xff] }
  0xff   :  { %215 = vmatpush.msrb.mxu0 %v186_v18 }
 0x100   :  { %v61_v25 = vadd.f32 %v270_v22, %v58_v24 }
 0x101   :  { %216 = vmatpush.msrb.mxu0 %v185_v19 }
 0x102   :  { %v62_v26 = vmax.f32 %v61_v25, 0.0  ;;  %v222_v25 = vlaneseq }
 0x103   :  { %217 = vmatpush.msrb.mxu0 %v184_v20 }
 0x104   :  { %95 = vmatmul.f32.vlgmr.msra.gmra.mxu1 %v62_v26  ;;  %v223_v26 = vand.u32 127, %v222_v25 }
 0x106   :  { %vm225_vm1 = vcmp.lt.s32.totalorder %v223_v26, 4  ;;  %vm242_vm3 = vcmp.ge.s32.totalorder %v223_v26, 4  ;;  %vm243_vm4 = vcmp.lt.s32.totalorder %v223_v26, 9 }
 0x107   :  { %vm338_vm5 = vmand %vm242_vm3, %vm243_vm4 }
 0x181   :  { %v96_v40 = vpop.f32.mrf.mxu1 }
 0x182   :  { %99 = vrot.lane.b32.xlu0 %v96_v40, %s312_s0 }
 0x1f4   :  { %v100_v58 = vpop.permute.xlu0 %99 }
 0x1f5   :  { %v101_v59 = vmax.f32 %v96_v40, %v100_v58 }
 0x1f7   :  { %v104_v60 = vadd.f32 %v271_v57, %v101_v59 }
 0x1f9   :  { %v105_v61 = vmax.f32 %v104_v60, 0.0 }
 0x1fb   :  { %140 = vmatmul.f32.vlgmr.msra.gmra.mxu2 %v105_v61 }
 0x27e   :  { %v141_v15 = vpop.f32.mrf.mxu2 }
 0x27f   :  { %v142_v16 = vadd.f32 %v272_v14, %v141_v15 }
 0x281   :  { %v144_v17 = vmax.f32 %v142_v16, 0.0 }
 0x283   :  { %179 = vmatmul.f32.vlgmr.msra.gmra.mxu3 %v144_v17 }
 0x306   :  { %v180_v22 = vpop.f32.mrf.mxu3 }
 0x307   :  { %v181_v23 = vadd.f32 %v273_v21, %v180_v22 }
 0x309   :  { %v183_v24 = vmax.f32 %v181_v23, 0.0 }
 0x30b   :  { %218 = vmatmul.f32.vlgmr.msrb.gmra.mxu0 %v183_v24 }
 0x388   :  { %v219_v28 = vpop.f32.mrf.mxu0 }
 0x389   :  { %v220_v29 = vadd.f32 %v274_v27, %v219_v28 }
 0x38b   :  { %v227_v30 = vsel %vm225_vm1, %v220_v29, -inf  ;;  %v245_v33 = vsel %vm338_vm5, %v220_v29, -inf }
 0x38c   :  { %v229_v31 = vsel %vm228_vm2, %v227_v30, -inf  ;;  %v246_v34 = vsel %vm228_vm2, %v245_v33, -inf }
 0x38d   :  { %230 = vmax.xlane.f32.xlu1 %v229_v31 }
 0x395   :  { %247 = vmax.xlane.f32.xlu1 %v246_v34 }
 0x400   :  { %v231_v35 = vpop.xlane.xlu1 %230 }
 0x401   :  { %v232_v36 = vsub.f32 %v220_v29, %v231_v35 }
 0x403   :  { %v233_v37 = vmul.f32 1.442695, %v232_v36 }
 0x405   :  { %275 = vpow2.f32 %v233_v37 }
 0x408   :  { %v248_v38 = vpop.xlane.xlu1 %247 }
 0x409   :  { %v249_v39 = vsub.f32 %v220_v29, %v248_v38 }
 0x40b   :  { %v276_v40 = vpop.eup %275  ;;  %v250_v41 = vmul.f32 1.442695, %v249_v39 }
 0x40c   :  { %v235_v42 = vsel %vm225_vm1, %v276_v40, 0.0 }
 0x40d   :  { %277 = vpow2.f32 %v250_v41  ;;  %v236_v43 = vsel %vm228_vm2, %v235_v42, 0.0 }
 0x40e   :  { %237 = vadd.xlane.f32.xlu2 %v236_v43 }
 0x413   :  { %v278_v44 = vpop.eup %277 }
 0x414   :  { %v252_v45 = vsel %vm338_vm5, %v278_v44, 0.0 }
 0x415   :  { %v253_v46 = vsel %vm228_vm2, %v252_v45, 0.0 }
 0x416   :  { %254 = vadd.xlane.f32.xlu2 %v253_v46 }
 0x481   :  { %v238_v47 = vpop.xlane.xlu2 %237 }
 0x482   :  { %279 = vrcp.f32 %v238_v47 }
 0x488   :  { %v280_v49 = vpop.eup %279 }
 0x489   :  { %v255_v48 = vpop.xlane.xlu2 %254  ;;  %v240_v51 = vmul.f32 %v280_v49, %v235_v42 }
 0x48a   :  { %281 = vrcp.f32 %v255_v48 }
 0x490   :  { %v282_v50 = vpop.eup %281 }
 0x491   :  { %v257_v52 = vmul.f32 %v282_v50, %v252_v45 }
 0x493   :  { %v258_v53 = vadd.f32 %v257_v52, %v240_v51 }
 0x495   :  { %259 = vst.msk [vmem:[%s356_s2] sm:$0xff] %vm228_vm2, %v258_v53 }
 0x496   :  { %264 = vsyncpa [#allocation3], 1 }

</bundles_post_ra>
